<compile_context>
chip_gen: v6e
topology: v6e:2x2x1
jax: 0.10.0
libtpu: 0.0.40
codegen_flags: <defaults>
</compile_context>

<pallas_src>
import functools

import jax
import jax.numpy as jnp
from jax.experimental import pallas as pl
from jax.experimental.pallas import tpu as pltpu


def _cdiv(a, b):
    return (a + b - 1) // b


def _round_up(x, m):
    return _cdiv(x, m) * m


def _pad2d(a, shape):
    return jnp.pad(a, ((0, shape[0] - a.shape[0]), (0, shape[1] - a.shape[1])))


# ---------------------------------------------------------------------------
# Kernel
# ---------------------------------------------------------------------------
def critic_kernel(x_ref, w1_ref, b1_ref, w2_ref, b2_ref,
                  w3_ref, b3_ref, w4_ref, b4_ref, out_ref):
    """Fused 4-layer MLP forward on one (TB, state_dim) batch tile."""
    cdt = w1_ref.dtype                        # dtype fed to the MXU (f32 or bf16)

    # Layer 1: Linear + ReLU   (Dropout -> identity in eval)
    x = x_ref[...].astype(cdt)
    h = jnp.dot(x, w1_ref[...], preferred_element_type=jnp.float32) + b1_ref[...]
    h = jnp.maximum(h, 0.0)

    # Layer 2: Linear + ReLU   (Dropout -> identity in eval)
    h = jnp.dot(h.astype(cdt), w2_ref[...],
                preferred_element_type=jnp.float32) + b2_ref[...]
    h = jnp.maximum(h, 0.0)

    # Layer 3: Linear + ReLU
    h = jnp.dot(h.astype(cdt), w3_ref[...],
                preferred_element_type=jnp.float32) + b3_ref[...]
    h = jnp.maximum(h, 0.0)

    # Layer 4: Linear(H, 1) as VPU multiply + lane reduce (avoids an N=1 MXU matmul).
    v = jnp.sum(h * w4_ref[...], axis=-1) + b4_ref[0]            # (TB,)
    # Lane-dense store: out block is (1, 1, TB) -> full-lane rows, no masked column.
    out_ref[...] = v.reshape(out_ref.shape).astype(out_ref.dtype)


# ---------------------------------------------------------------------------
# Tiling / resource helpers
# ---------------------------------------------------------------------------
def _choose_batch_tile(batch, block_b, *, min_split=512):
    """Balanced batch tiles: multiple of 8, padding < one tile, and an even grid of
    >= 2 steps once the batch is large enough to feed both v7x TensorCores."""
    block_b = max(8, _round_up(block_b, 8))
    n_tiles = _cdiv(batch, block_b)
    if batch >= min_split:
        n_tiles = max(n_tiles, 2)
    if n_tiles > 1 and n_tiles % 2:
        n_tiles += 1                          # even grid -> balanced megacore split
    tb = _round_up(_cdiv(batch, n_tiles), 8)
    b_pad = _round_up(batch, tb)
    return tb, b_pad


def _vmem_limit_bytes(tb, s, h_pad, weights_dtype, weight_bufs):
    """Footprint-derived VMEM budget, capped well under v7x's 64 MiB physical VMEM."""
    wsize = jnp.dtype(weights_dtype).itemsize
    weights = weight_bufs * ((s * h_pad + 2 * h_pad * h_pad + h_pad) * wsize
                             + 3 * h_pad * 4)            # padded weights + f32 biases
    io = 2 * tb * s * 4 + 2 * tb * 4                     # double-buffered in/out tiles
    act = 3 * tb * h_pad * 4                             # live f32 activations / temps
    footprint = weights + io + act
    return int(min(48 * 2**20, max(16 * 2**20, 2 * footprint)))


# ---------------------------------------------------------------------------
# Forward pass
# ---------------------------------------------------------------------------
@functools.partial(jax.jit, static_argnames=("block_b", "single_buffer_weights"))
def _critic_forward_jit(state, prepared, block_b, single_buffer_weights):
    w1p, b1p, w2p, b2p, w3p, b3p, w4p, b4s = prepared
    batch, s_dim = state.shape
    h_pad = w1p.shape[1]

    tb, b_pad = _choose_batch_tile(batch, block_b)
    num_tiles = b_pad // tb
    x = state if b_pad == batch else jnp.pad(state, ((0, b_pad - batch), (0, 0)))

    weight_bufs = 1 if single_buffer_weights else 2

    def const(shape):
        # Constant block index -> fetched once and pinned; single-buffer to halve
        # the pinned weight VMEM (decisive headroom for large H on v7x).
        if single_buffer_weights:
            return pl.BlockSpec(shape, lambda i: (0, 0), pipeline_mode=pl.Buffered(1))
        return pl.BlockSpec(shape, lambda i: (0, 0))

    flops = 2 * b_pad * (s_dim * h_pad + 2 * h_pad * h_pad + h_pad)
    weight_bytes = ((s_dim * h_pad + 2 * h_pad * h_pad + h_pad) * w1p.dtype.itemsize
                    + 3 * h_pad * 4 + 4)
    bytes_accessed = b_pad * s_dim * x.dtype.itemsize + weight_bytes + b_pad * 4

    out = pl.pallas_call(
        critic_kernel,
        out_shape=jax.ShapeDtypeStruct((num_tiles, 1, tb), jnp.float32),
        grid=(num_tiles,),
        in_specs=[
            pl.BlockSpec((tb, s_dim), lambda i: (i, 0)),        # state tile
            const((s_dim, h_pad)),                              # w1 (pinned)
            const((1, h_pad)),                                  # b1
            const((h_pad, h_pad)),                              # w2
            const((1, h_pad)),                                  # b2
            const((h_pad, h_pad)),                              # w3
            const((1, h_pad)),                                  # b3
            const((1, h_pad)),                                  # w4 row (VPU reduce)
            pl.BlockSpec(memory_space=pltpu.MemorySpace.SMEM),  # b4 scalar
        ],
        out_specs=pl.BlockSpec((1, 1, tb), lambda i: (i, 0, 0)),
        compiler_params=pltpu.CompilerParams(
            dimension_semantics=("parallel",),
            vmem_limit_bytes=_vmem_limit_bytes(tb, s_dim, h_pad, w1p.dtype,
                                               weight_bufs),
        ),
        cost_estimate=pl.CostEstimate(
            flops=flops, transcendentals=0, bytes_accessed=bytes_accessed),
    )(x, w1p, b1p, w2p, b2p, w3p, b3p, w4p, b4s)

    return out.reshape(b_pad, 1)[:batch]


_BUFFERED_1_SUPPORTED = True


def critic_forward(state, prepared, *, block_b=1024):
    """state: (B, state_dim) f32 or bf16.  prepared: output of prepare_params().
    Returns critic values of shape (B, 1) f32."""
    global _BUFFERED_1_SUPPORTED
    if _BUFFERED_1_SUPPORTED:
        try:
            return _critic_forward_jit(state, prepared, block_b, True)
        except Exception:  # pragma: no cover - fallback if Buffered(1) unsupported
            _BUFFERED_1_SUPPORTED = False
    return _critic_forward_jit(state, prepared, block_b, False)


# ---------------------------------------------------------------------------
# Parameter preparation (outside the hot path) and reference
# ---------------------------------------------------------------------------
def prepare_params(params, *, weights_dtype=None):
    """Pad/cast the Linear parameters once so no padding/casting runs per call.

    Hidden features are zero-padded to a multiple of 128 (full 128-lane MXU tiles).
    Weights stay f32 for small hidden sizes (kernel is DMA/overhead bound, so f32 is
    free and matches the PyTorch reference); bf16 for large hidden sizes (VMEM)."""
    w1, b1, w2, b2, w3, b3, w4, b4 = params
    s_dim, h = w1.shape
    h_pad = _round_up(h, 128)
    if weights_dtype is None:
        weights_dtype = jnp.float32 if h_pad <= 512 else jnp.bfloat16

    w1p = _pad2d(w1, (s_dim, h_pad)).astype(weights_dtype)
    w2p = _pad2d(w2, (h_pad, h_pad)).astype(weights_dtype)
    w3p = _pad2d(w3, (h_pad, h_pad)).astype(weights_dtype)
    b1p = _pad2d(b1.reshape(1, -1), (1, h_pad)).astype(jnp.float32)
    b2p = _pad2d(b2.reshape(1, -1), (1, h_pad)).astype(jnp.float32)
    b3p = _pad2d(b3.reshape(1, -1), (1, h_pad)).astype(jnp.float32)
    w4p = _pad2d(w4.reshape(1, -1), (1, h_pad)).astype(jnp.float32)  # VPU row, f32
    b4s = b4.reshape(-1).astype(jnp.float32)                         # (1,) -> SMEM
    return (w1p, b1p, w2p, b2p, w3p, b3p, w4p, b4s)


def init_params(key, state_dim, hidden_dim):
    """Deterministic init mimicking nn.Linear's U(-1/sqrt(fan_in), 1/sqrt(fan_in))."""
    def linear(key, fan_in, fan_out):
        kw, kb = jax.random.split(key)
        bound = 1.0 / jnp.sqrt(fan_in)
        w = jax.random.uniform(kw, (fan_in, fan_out), jnp.float32, -bound, bound)
        b = jax.random.uniform(kb, (1, fan_out), jnp.float32, -bound, bound)
        return w, b

    k1, k2, k3, k4 = jax.random.split(key, 4)
    w1, b1 = linear(k1, state_dim, hidden_dim)
    w2, b2 = linear(k2, hidden_dim, hidden_dim)
    w3, b3 = linear(k3, hidden_dim, hidden_dim)
    w4, b4 = linear(k4, hidden_dim, 1)
    return (w1, b1, w2, b2, w3, b3, w4, b4)


def reference_forward(state, params):
    """Pure JAX reference matching the PyTorch module in eval mode."""
    w1, b1, w2, b2, w3, b3, w4, b4 = params
    h = jnp.maximum(state @ w1 + b1, 0.0)
    h = jnp.maximum(h @ w2 + b2, 0.0)
    h = jnp.maximum(h @ w3 + b3, 0.0)
    return h @ w4 + b4


if __name__ == "__main__":
    key = jax.random.PRNGKey(0)
    k_state, k_state2, k_params = jax.random.split(key, 3)

    # Small shapes consistent with CriticNetwork(state_dim=16, hidden_dim=32).
    state_dim, hidden_dim = 16, 32
    params = init_params(k_params, state_dim, hidden_dim)
    prepared = prepare_params(params)        # pad/cast once, outside the hot path

    # 1) Tiny batch (single grid step).
    state = jax.random.normal(k_state, (8, state_dim), jnp.float32)
    out = jax.block_until_ready(critic_forward(state, prepared))
    assert out.shape == (8, 1), out.shape
    ref = reference_forward(state, params)
    assert jnp.allclose(out, ref, atol=2e-2, rtol=2e-2), float(jnp.abs(out - ref).max())

    # 2) Awkward batch size: exercises the balanced multi-tile (even) grid,
    #    batch padding, and the padding slice-off.
    state2 = jax.random.normal(k_state2, (519, state_dim), jnp.float32)
    out2 = jax.block_until_ready(critic_forward(state2, prepared))
    assert out2.shape == (519, 1), out2.shape
    ref2 = reference_forward(state2, params)
    assert jnp.allclose(out2, ref2, atol=2e-2, rtol=2e-2), float(jnp.abs(out2 - ref2).max())

    print("KERNEL_OK")
</pallas_src>

<mosaic_0001>
module attributes {stable_mosaic.version = 11 : i64} {
  func.func @critic_kernel(%arg0: i32, %arg1: memref<8x16xf32, #tpu.memory_space<vmem>>, %arg2: memref<16x128xf32, #tpu.memory_space<vmem>>, %arg3: memref<1x128xf32, #tpu.memory_space<vmem>>, %arg4: memref<128x128xf32, #tpu.memory_space<vmem>>, %arg5: memref<1x128xf32, #tpu.memory_space<vmem>>, %arg6: memref<128x128xf32, #tpu.memory_space<vmem>>, %arg7: memref<1x128xf32, #tpu.memory_space<vmem>>, %arg8: memref<1x128xf32, #tpu.memory_space<vmem>>, %arg9: memref<1xf32, #tpu.memory_space<smem>>, %arg10: memref<1x1x8xf32, #tpu.memory_space<vmem>>) attributes {dimension_semantics = [#tpu.dimension_semantics<parallel>], iteration_bounds = array<i64: 1>, scalar_prefetch = 0 : i64, scratch_operands = 0 : i64, tpu.core_type = #tpu.core_type<tc>, window_params = [{transform_indices = @transform_0, window_bounds = array<i64: 8, 16>}, {pipeline_mode = #tpu.pipeline_mode<synchronous>, transform_indices = @transform_1, window_bounds = array<i64: 16, 128>}, {pipeline_mode = #tpu.pipeline_mode<synchronous>, transform_indices = @transform_2, window_bounds = array<i64: 1, 128>}, {pipeline_mode = #tpu.pipeline_mode<synchronous>, transform_indices = @transform_3, window_bounds = array<i64: 128, 128>}, {pipeline_mode = #tpu.pipeline_mode<synchronous>, transform_indices = @transform_4, window_bounds = array<i64: 1, 128>}, {pipeline_mode = #tpu.pipeline_mode<synchronous>, transform_indices = @transform_5, window_bounds = array<i64: 128, 128>}, {pipeline_mode = #tpu.pipeline_mode<synchronous>, transform_indices = @transform_6, window_bounds = array<i64: 1, 128>}, {pipeline_mode = #tpu.pipeline_mode<synchronous>, transform_indices = @transform_7, window_bounds = array<i64: 1, 128>}, {transform_indices = @transform_8, window_bounds = array<i64: 1>}, {transform_indices = @transform_9, window_bounds = array<i64: 1, 1, 8>}]} {
    %c0 = arith.constant 0 : index
    %c0_0 = arith.constant 0 : index
    %0 = vector.load %arg1[%c0, %c0_0] : memref<8x16xf32, #tpu.memory_space<vmem>>, vector<8x16xf32>
    %c0_1 = arith.constant 0 : index
    %c0_2 = arith.constant 0 : index
    %1 = vector.load %arg2[%c0_1, %c0_2] : memref<16x128xf32, #tpu.memory_space<vmem>>, vector<16x128xf32>
    %cst = arith.constant dense<0.000000e+00> : vector<8x128xf32>
    %2 = tpu.matmul %0, %1, %cst {dimension_numbers = #tpu.dot_dimension_numbers<[1], [0], [0], [1], [0, 0, 1, 1], [], []>} : vector<8x16xf32>, vector<16x128xf32>, vector<8x128xf32> -> vector<8x128xf32>
    %c0_3 = arith.constant 0 : index
    %c0_4 = arith.constant 0 : index
    %3 = vector.load %arg3[%c0_3, %c0_4] : memref<1x128xf32, #tpu.memory_space<vmem>>, vector<1x128xf32>
    %4 = vector.broadcast %3 : vector<1x128xf32> to vector<8x128xf32>
    %5 = arith.addf %2, %4 : vector<8x128xf32>
    %cst_5 = arith.constant 0.000000e+00 : f32
    %6 = vector.broadcast %cst_5 : f32 to vector<8x128xf32>
    %7 = arith.maximumf %5, %6 : vector<8x128xf32>
    %c0_6 = arith.constant 0 : index
    %c0_7 = arith.constant 0 : index
    %8 = vector.load %arg4[%c0_6, %c0_7] : memref<128x128xf32, #tpu.memory_space<vmem>>, vector<128x128xf32>
    %cst_8 = arith.constant dense<0.000000e+00> : vector<8x128xf32>
    %9 = tpu.matmul %7, %8, %cst_8 {dimension_numbers = #tpu.dot_dimension_numbers<[1], [0], [0], [1], [0, 0, 1, 1], [], []>} : vector<8x128xf32>, vector<128x128xf32>, vector<8x128xf32> -> vector<8x128xf32>
    %c0_9 = arith.constant 0 : index
    %c0_10 = arith.constant 0 : index
    %10 = vector.load %arg5[%c0_9, %c0_10] : memref<1x128xf32, #tpu.memory_space<vmem>>, vector<1x128xf32>
    %11 = vector.broadcast %10 : vector<1x128xf32> to vector<8x128xf32>
    %12 = arith.addf %9, %11 : vector<8x128xf32>
    %cst_11 = arith.constant 0.000000e+00 : f32
    %13 = vector.broadcast %cst_11 : f32 to vector<8x128xf32>
    %14 = arith.maximumf %12, %13 : vector<8x128xf32>
    %c0_12 = arith.constant 0 : index
    %c0_13 = arith.constant 0 : index
    %15 = vector.load %arg6[%c0_12, %c0_13] : memref<128x128xf32, #tpu.memory_space<vmem>>, vector<128x128xf32>
    %cst_14 = arith.constant dense<0.000000e+00> : vector<8x128xf32>
    %16 = tpu.matmul %14, %15, %cst_14 {dimension_numbers = #tpu.dot_dimension_numbers<[1], [0], [0], [1], [0, 0, 1, 1], [], []>} : vector<8x128xf32>, vector<128x128xf32>, vector<8x128xf32> -> vector<8x128xf32>
    %c0_15 = arith.constant 0 : index
    %c0_16 = arith.constant 0 : index
    %17 = vector.load %arg7[%c0_15, %c0_16] : memref<1x128xf32, #tpu.memory_space<vmem>>, vector<1x128xf32>
    %18 = vector.broadcast %17 : vector<1x128xf32> to vector<8x128xf32>
    %19 = arith.addf %16, %18 : vector<8x128xf32>
    %cst_17 = arith.constant 0.000000e+00 : f32
    %20 = vector.broadcast %cst_17 : f32 to vector<8x128xf32>
    %21 = arith.maximumf %19, %20 : vector<8x128xf32>
    %c0_18 = arith.constant 0 : index
    %c0_19 = arith.constant 0 : index
    %22 = vector.load %arg8[%c0_18, %c0_19] : memref<1x128xf32, #tpu.memory_space<vmem>>, vector<1x128xf32>
    %23 = vector.broadcast %22 : vector<1x128xf32> to vector<8x128xf32>
    %24 = arith.mulf %21, %23 : vector<8x128xf32>
    %cst_20 = arith.constant dense<0.000000e+00> : vector<8xf32>
    %25 = vector.multi_reduction <add>, %24, %cst_20 [1] : vector<8x128xf32> to vector<8xf32>
    %c0_21 = arith.constant 0 : index
    %26 = memref.load %arg9[%c0_21] : memref<1xf32, #tpu.memory_space<smem>>
    %27 = vector.broadcast %26 : f32 to vector<8xf32>
    %28 = arith.addf %25, %27 : vector<8xf32>
    %29 = vector.shape_cast %28 : vector<8xf32> to vector<1x1x8xf32>
    %c0_22 = arith.constant 0 : index
    %c0_23 = arith.constant 0 : index
    %c0_24 = arith.constant 0 : index
    %30 = vector.load %arg10[%c0_22, %c0_23, %c0_24] : memref<1x1x8xf32, #tpu.memory_space<vmem>>, vector<1x1x8xf32>
    tpu.vector_store %arg10[%c0_22, %c0_23, %c0_24], %29 {strides = array<i32>} : memref<1x1x8xf32, #tpu.memory_space<vmem>>, vector<1x1x8xf32>,
    return
  }
  func.func @transform_0(%arg0: i32) -> (i32, i32) {
    %c0_i32 = arith.constant 0 : i32
    %c0_i32_0 = arith.constant 0 : i32
    return %arg0, %c0_i32 : i32, i32
  }
  func.func @transform_1(%arg0: i32) -> (i32, i32) {
    %c0_i32 = arith.constant 0 : i32
    %c0_i32_0 = arith.constant 0 : i32
    %c0_i32_1 = arith.constant 0 : i32
    return %c0_i32, %c0_i32_0 : i32, i32
  }
  func.func @transform_2(%arg0: i32) -> (i32, i32) {
    %c0_i32 = arith.constant 0 : i32
    %c0_i32_0 = arith.constant 0 : i32
    %c0_i32_1 = arith.constant 0 : i32
    return %c0_i32, %c0_i32_0 : i32, i32
  }
  func.func @transform_3(%arg0: i32) -> (i32, i32) {
    %c0_i32 = arith.constant 0 : i32
    %c0_i32_0 = arith.constant 0 : i32
    %c0_i32_1 = arith.constant 0 : i32
    return %c0_i32, %c0_i32_0 : i32, i32
  }
  func.func @transform_4(%arg0: i32) -> (i32, i32) {
    %c0_i32 = arith.constant 0 : i32
    %c0_i32_0 = arith.constant 0 : i32
    %c0_i32_1 = arith.constant 0 : i32
    return %c0_i32, %c0_i32_0 : i32, i32
  }
  func.func @transform_5(%arg0: i32) -> (i32, i32) {
    %c0_i32 = arith.constant 0 : i32
    %c0_i32_0 = arith.constant 0 : i32
    %c0_i32_1 = arith.constant 0 : i32
    return %c0_i32, %c0_i32_0 : i32, i32
  }
  func.func @transform_6(%arg0: i32) -> (i32, i32) {
    %c0_i32 = arith.constant 0 : i32
    %c0_i32_0 = arith.constant 0 : i32
    %c0_i32_1 = arith.constant 0 : i32
    return %c0_i32, %c0_i32_0 : i32, i32
  }
  func.func @transform_7(%arg0: i32) -> (i32, i32) {
    %c0_i32 = arith.constant 0 : i32
    %c0_i32_0 = arith.constant 0 : i32
    %c0_i32_1 = arith.constant 0 : i32
    return %c0_i32, %c0_i32_0 : i32, i32
  }
  func.func @transform_8(%arg0: i32) -> i32 {
    %c0_i32 = arith.constant 0 : i32
    %c0_i32_0 = arith.constant 0 : i32
    return %c0_i32 : i32
  }
  func.func @transform_9(%arg0: i32) -> (i32, i32, i32) {
    %c0_i32 = arith.constant 0 : i32
    %c0_i32_0 = arith.constant 0 : i32
    %c0_i32_1 = arith.constant 0 : i32
    return %arg0, %c0_i32, %c0_i32_0 : i32, i32, i32
  }
}

module attributes {stable_mosaic.version = 11 : i64} {
  func.func @critic_kernel(%arg0: i32, %arg1: memref<8x16xf32, #tpu.memory_space<vmem>>, %arg2: memref<16x128xf32, #tpu.memory_space<vmem>>, %arg3: memref<1x128xf32, #tpu.memory_space<vmem>>, %arg4: memref<128x128xf32, #tpu.memory_space<vmem>>, %arg5: memref<1x128xf32, #tpu.memory_space<vmem>>, %arg6: memref<128x128xf32, #tpu.memory_space<vmem>>, %arg7: memref<1x128xf32, #tpu.memory_space<vmem>>, %arg8: memref<1x128xf32, #tpu.memory_space<vmem>>, %arg9: memref<1xf32, #tpu.memory_space<smem>>, %arg10: memref<1x1x8xf32, #tpu.memory_space<vmem>>) attributes {dimension_semantics = [#tpu.dimension_semantics<parallel>], iteration_bounds = array<i64: 1>, scalar_prefetch = 0 : i64, scratch_operands = 0 : i64, tpu.core_type = #tpu.core_type<tc>, window_params = [{transform_indices = @transform_0, window_bounds = array<i64: 8, 16>}, {pipeline_mode = #tpu.pipeline_mode<synchronous>, transform_indices = @transform_1, window_bounds = array<i64: 16, 128>}, {pipeline_mode = #tpu.pipeline_mode<synchronous>, transform_indices = @transform_2, window_bounds = array<i64: 1, 128>}, {pipeline_mode = #tpu.pipeline_mode<synchronous>, transform_indices = @transform_3, window_bounds = array<i64: 128, 128>}, {pipeline_mode = #tpu.pipeline_mode<synchronous>, transform_indices = @transform_4, window_bounds = array<i64: 1, 128>}, {pipeline_mode = #tpu.pipeline_mode<synchronous>, transform_indices = @transform_5, window_bounds = array<i64: 128, 128>}, {pipeline_mode = #tpu.pipeline_mode<synchronous>, transform_indices = @transform_6, window_bounds = array<i64: 1, 128>}, {pipeline_mode = #tpu.pipeline_mode<synchronous>, transform_indices = @transform_7, window_bounds = array<i64: 1, 128>}, {transform_indices = @transform_8, window_bounds = array<i64: 1>}, {transform_indices = @transform_9, window_bounds = array<i64: 1, 1, 8>}]} {
    %c0 = arith.constant 0 : index
    %c0_0 = arith.constant 0 : index
    %0 = vector.load %arg1[%c0, %c0_0] : memref<8x16xf32, #tpu.memory_space<vmem>>, vector<8x16xf32>
    %c0_1 = arith.constant 0 : index
    %c0_2 = arith.constant 0 : index
    %1 = vector.load %arg2[%c0_1, %c0_2] : memref<16x128xf32, #tpu.memory_space<vmem>>, vector<16x128xf32>
    %cst = arith.constant dense<0.000000e+00> : vector<8x128xf32>
    %2 = tpu.matmul %0, %1, %cst {dimension_numbers = #tpu.dot_dimension_numbers<[1], [0], [0], [1], [0, 0, 1, 1], [], []>} : vector<8x16xf32>, vector<16x128xf32>, vector<8x128xf32> -> vector<8x128xf32>
    %c0_3 = arith.constant 0 : index
    %c0_4 = arith.constant 0 : index
    %3 = vector.load %arg3[%c0_3, %c0_4] : memref<1x128xf32, #tpu.memory_space<vmem>>, vector<1x128xf32>
    %4 = vector.broadcast %3 : vector<1x128xf32> to vector<8x128xf32>
    %5 = arith.addf %2, %4 : vector<8x128xf32>
    %cst_5 = arith.constant 0.000000e+00 : f32
    %6 = vector.broadcast %cst_5 : f32 to vector<8x128xf32>
    %7 = arith.maximumf %5, %6 : vector<8x128xf32>
    %c0_6 = arith.constant 0 : index
    %c0_7 = arith.constant 0 : index
    %8 = vector.load %arg4[%c0_6, %c0_7] : memref<128x128xf32, #tpu.memory_space<vmem>>, vector<128x128xf32>
    %cst_8 = arith.constant dense<0.000000e+00> : vector<8x128xf32>
    %9 = tpu.matmul %7, %8, %cst_8 {dimension_numbers = #tpu.dot_dimension_numbers<[1], [0], [0], [1], [0, 0, 1, 1], [], []>} : vector<8x128xf32>, vector<128x128xf32>, vector<8x128xf32> -> vector<8x128xf32>
    %c0_9 = arith.constant 0 : index
    %c0_10 = arith.constant 0 : index
    %10 = vector.load %arg5[%c0_9, %c0_10] : memref<1x128xf32, #tpu.memory_space<vmem>>, vector<1x128xf32>
    %11 = vector.broadcast %10 : vector<1x128xf32> to vector<8x128xf32>
    %12 = arith.addf %9, %11 : vector<8x128xf32>
    %cst_11 = arith.constant 0.000000e+00 : f32
    %13 = vector.broadcast %cst_11 : f32 to vector<8x128xf32>
    %14 = arith.maximumf %12, %13 : vector<8x128xf32>
    %c0_12 = arith.constant 0 : index
    %c0_13 = arith.constant 0 : index
    %15 = vector.load %arg6[%c0_12, %c0_13] : memref<128x128xf32, #tpu.memory_space<vmem>>, vector<128x128xf32>
    %cst_14 = arith.constant dense<0.000000e+00> : vector<8x128xf32>
    %16 = tpu.matmul %14, %15, %cst_14 {dimension_numbers = #tpu.dot_dimension_numbers<[1], [0], [0], [1], [0, 0, 1, 1], [], []>} : vector<8x128xf32>, vector<128x128xf32>, vector<8x128xf32> -> vector<8x128xf32>
    %c0_15 = arith.constant 0 : index
    %c0_16 = arith.constant 0 : index
    %17 = vector.load %arg7[%c0_15, %c0_16] : memref<1x128xf32, #tpu.memory_space<vmem>>, vector<1x128xf32>
    %18 = vector.broadcast %17 : vector<1x128xf32> to vector<8x128xf32>
    %19 = arith.addf %16, %18 : vector<8x128xf32>
    %cst_17 = arith.constant 0.000000e+00 : f32
    %20 = vector.broadcast %cst_17 : f32 to vector<8x128xf32>
    %21 = arith.maximumf %19, %20 : vector<8x128xf32>
    %c0_18 = arith.constant 0 : index
    %c0_19 = arith.constant 0 : index
    %22 = vector.load %arg8[%c0_18, %c0_19] : memref<1x128xf32, #tpu.memory_space<vmem>>, vector<1x128xf32>
    %23 = vector.broadcast %22 : vector<1x128xf32> to vector<8x128xf32>
    %24 = arith.mulf %21, %23 : vector<8x128xf32>
    %cst_20 = arith.constant dense<0.000000e+00> : vector<8xf32>
    %25 = vector.multi_reduction <add>, %24, %cst_20 [1] : vector<8x128xf32> to vector<8xf32>
    %c0_21 = arith.constant 0 : index
    %26 = memref.load %arg9[%c0_21] : memref<1xf32, #tpu.memory_space<smem>>
    %27 = vector.broadcast %26 : f32 to vector<8xf32>
    %28 = arith.addf %25, %27 : vector<8xf32>
    %29 = vector.shape_cast %28 : vector<8xf32> to vector<1x1x8xf32>
    %c0_22 = arith.constant 0 : index
    %c0_23 = arith.constant 0 : index
    %c0_24 = arith.constant 0 : index
    %30 = vector.load %arg10[%c0_22, %c0_23, %c0_24] : memref<1x1x8xf32, #tpu.memory_space<vmem>>, vector<1x1x8xf32>
    tpu.vector_store %arg10[%c0_22, %c0_23, %c0_24], %29 {strides = array<i32>} : memref<1x1x8xf32, #tpu.memory_space<vmem>>, vector<1x1x8xf32>,
    return
  }
  func.func @transform_0(%arg0: i32) -> (i32, i32) {
    %c0_i32 = arith.constant 0 : i32
    %c0_i32_0 = arith.constant 0 : i32
    return %arg0, %c0_i32 : i32, i32
  }
  func.func @transform_1(%arg0: i32) -> (i32, i32) {
    %c0_i32 = arith.constant 0 : i32
    %c0_i32_0 = arith.constant 0 : i32
    %c0_i32_1 = arith.constant 0 : i32
    return %c0_i32, %c0_i32_0 : i32, i32
  }
  func.func @transform_2(%arg0: i32) -> (i32, i32) {
    %c0_i32 = arith.constant 0 : i32
    %c0_i32_0 = arith.constant 0 : i32
    %c0_i32_1 = arith.constant 0 : i32
    return %c0_i32, %c0_i32_0 : i32, i32
  }
  func.func @transform_3(%arg0: i32) -> (i32, i32) {
    %c0_i32 = arith.constant 0 : i32
    %c0_i32_0 = arith.constant 0 : i32
    %c0_i32_1 = arith.constant 0 : i32
    return %c0_i32, %c0_i32_0 : i32, i32
  }
  func.func @transform_4(%arg0: i32) -> (i32, i32) {
    %c0_i32 = arith.constant 0 : i32
    %c0_i32_0 = arith.constant 0 : i32
    %c0_i32_1 = arith.constant 0 : i32
    return %c0_i32, %c0_i32_0 : i32, i32
  }
  func.func @transform_5(%arg0: i32) -> (i32, i32) {
    %c0_i32 = arith.constant 0 : i32
    %c0_i32_0 = arith.constant 0 : i32
    %c0_i32_1 = arith.constant 0 : i32
    return %c0_i32, %c0_i32_0 : i32, i32
  }
  func.func @transform_6(%arg0: i32) -> (i32, i32) {
    %c0_i32 = arith.constant 0 : i32
    %c0_i32_0 = arith.constant 0 : i32
    %c0_i32_1 = arith.constant 0 : i32
    return %c0_i32, %c0_i32_0 : i32, i32
  }
  func.func @transform_7(%arg0: i32) -> (i32, i32) {
    %c0_i32 = arith.constant 0 : i32
    %c0_i32_0 = arith.constant 0 : i32
    %c0_i32_1 = arith.constant 0 : i32
    return %c0_i32, %c0_i32_0 : i32, i32
  }
  func.func @transform_8(%arg0: i32) -> i32 {
    %c0_i32 = arith.constant 0 : i32
    %c0_i32_0 = arith.constant 0 : i32
    return %c0_i32 : i32
  }
  func.func @transform_9(%arg0: i32) -> (i32, i32, i32) {
    %c0_i32 = arith.constant 0 : i32
    %c0_i32_0 = arith.constant 0 : i32
    %c0_i32_1 = arith.constant 0 : i32
    return %arg0, %c0_i32, %c0_i32_0 : i32, i32, i32
  }
}

</mosaic_0001>

<bundles_post_ra>
// kernel: _critic_forward_jit.1
= control target key start
LH: loop header
LB: loop body
LE: loop exit
PB: predicated region body
PF: predicated region fallthrough
CT: control target
= control target key end

     0   :  { %15 = vsyncpa [#allocation4], 0  ;;  %s774_s0 = inlined_call_operand.hbm [shape: f32[8,16], index: 0, kind: input, shape index: {}]   ;;  %s775_s1 = inlined_call_operand.hbm [shape: f32[16,128], index: 1, kind: input, shape index: {}]   ;;  %s776_s2 = inlined_call_operand.vmem [shape: f32[1,128], index: 2, kind: input, shape index: {}]   ;;  %s777_s3 = inlined_call_operand.hbm [shape: f32[128,128], index: 3, kind: input, shape index: {}]   ;;  %s778_s4 = inlined_call_operand.vmem [shape: f32[1,128], index: 4, kind: input, shape index: {}]   ;;  %s779_s5 = inlined_call_operand.hbm [shape: f32[128,128], index: 5, kind: input, shape index: {}]   ;;  %s780_s6 = inlined_call_operand.vmem [shape: f32[1,128], index: 6, kind: input, shape index: {}]   ;;  %s781_s7 = inlined_call_operand.vmem [shape: f32[1,128], index: 7, kind: input, shape index: {}]   ;;  %s782_s8 = inlined_call_operand.<no memory space> [shape: f32[1], index: 8, kind: input, shape index: {}]   ;;  %s783_s9 = inlined_call_operand.hbm [shape: f32[1,1,8], index: 9, kind: output, shape index: {}]  }
   0x1   :  { %16 = vsyncpa [#allocation7], 0 }
   0x2   :  { %17 = vsyncpa [#allocation10], 0 }
   0x3   :  { %18 = vsyncpa [#allocation5], 0  ;;  %s636_s30 = smov [#allocation6]  }
   0x4   :  { %s34_s10 = sshll.u32 %s636_s30, 4  ;;  %s35_s10 = int_to_ptr.vmem [resolvable:$true] %s34_s10 }
   0x5   :  { %s536_s11 = scalar_lea.vmem %s35_s10, 256  ;;  %p541_p1 = scmp.lt.s32.totalorder %s35_s10, %s35_s10 }
   0x6   :  { %p537_p0 = scmp.ne.s32.totalorder %s35_s10, %s536_s11  ;;  %p542_p2 = scmp.lt.s32.totalorder %s536_s11, %s536_s11 }
   0x8   :  { %p543_p3 = por %p542_p2, %p541_p1 }
   0xa   :  { %p544_p4 = pnand %p543_p3, %p537_p0 }
   0xc   :  { %547 = shalt.err (!%p544_p4)
}
   0xd   :  { %s637_s12 = smov 128   ;;  %s638_s13 = smov 8  }
   0xe   :  { %40 = dma.hbm_to_vmem [thread:$0]  %s775_s1, 256, %s35_s10, [#allocation7], %s637_s12, %s637_s12, %s638_s13  }
   0xf   :  { %s639_s16 = smov [#allocation3]   ;;  %s640_s18 = smov [#allocation8]  }
  0x10   :  { %s25_s17 = sshll.u32 %s639_s16, 4  ;;  %s48_s19 = sshll.u32 %s640_s18, 4  ;;  %s26_s17 = int_to_ptr.vmem [resolvable:$true] %s25_s17  ;;  %s49_s19 = int_to_ptr.vmem [resolvable:$true] %s48_s19 }
  0x11   :  { %s556_s20 = scalar_lea.vmem %s26_s17, 128  ;;  %p561_p6 = scmp.lt.s32.totalorder %s26_s17, %s26_s17 }
  0x12   :  { %p557_p5 = scmp.ne.s32.totalorder %s26_s17, %s556_s20  ;;  %p562_p7 = scmp.lt.s32.totalorder %s556_s20, %s556_s20 }
  0x14   :  { %p563_p8 = por %p562_p7, %p561_p6 }
  0x16   :  { %p564_p9 = pnand %p563_p8, %p557_p5 }
  0x18   :  { %567 = shalt.err (!%p564_p9)
}
  0x19   :  { %28 = dma.hbm_to_vmem [thread:$0]  %s774_s0, 128, %s26_s17, [#allocation4]  }
  0x1a   :  { %s576_s23 = scalar_lea.vmem %s49_s19, 2048  ;;  %p581_p11 = scmp.lt.s32.totalorder %s49_s19, %s49_s19 }
  0x1b   :  { %p577_p10 = scmp.ne.s32.totalorder %s49_s19, %s576_s23  ;;  %p582_p12 = scmp.lt.s32.totalorder %s576_s23, %s576_s23 }
  0x1d   :  { %p583_p13 = por %p582_p12, %p581_p11 }
  0x1f   :  { %p584_p0 = pnand %p583_p13, %p577_p10 }
  0x21   :  { %587 = shalt.err (!%p584_p0)
}
  0x22   :  { %54 = dma.hbm_to_vmem [thread:$0]  %s777_s3, 2048, %s49_s19, [#allocation7], %s637_s12, %s637_s12, %s638_s13  }
  0x23   :  { %s641_s25 = smov [#allocation9]  }
  0x24   :  { %s62_s26 = sshll.u32 %s641_s25, 4  ;;  %s63_s26 = int_to_ptr.vmem [resolvable:$true] %s62_s26 }
  0x25   :  { %s596_s27 = scalar_lea.vmem %s63_s26, 2048  ;;  %p601_p2 = scmp.lt.s32.totalorder %s63_s26, %s63_s26 }
  0x26   :  { %p597_p1 = scmp.ne.s32.totalorder %s63_s26, %s596_s27  ;;  %p602_p3 = scmp.lt.s32.totalorder %s596_s27, %s596_s27 }
  0x28   :  { %p603_p4 = por %p602_p3, %p601_p2 }
  0x2a   :  { %p604_p5 = pnand %p603_p4, %p597_p1 }
  0x2c   :  { %607 = shalt.err (!%p604_p5)
}
  0x2d   :  { %68 = dma.hbm_to_vmem [thread:$0]  %s779_s5, 2048, %s63_s26, [#allocation10], %s637_s12, %s637_s12, %s638_s13  }
  0x2e   :  { %628 = dma.done.wait [#allocation4], 128  }
  0x2f   :  { %629 = vsyncadd [#allocation4], 4294967168 }
  0x30   :  { %630 = dma.done.wait [#allocation7], 2304  }
  0x31   :  { %631 = vsyncadd [#allocation7], 4294964992 }
  0x32   :  { %632 = dma.done.wait [#allocation10], 2048  }
  0x33   :  { %633 = vsyncadd [#allocation10], 4294965248  ;;  %v642_v0 = vmov 0.0   ;;  %vm643_vm0 = vmmov 0   ;;  %v89_v1 = vld [vmem:[#allocation6 + $0x8] sm:$0xff]  ;;  %v88_v2 = vld [vmem:[#allocation6] sm:$0xff]  ;;  %v374_v53 = vlaneseq  ;;  %v371_v56 = vstv %s782_s8 }
  0x34   :  { %442 = vmatprep.subr.mxu0 %v642_v0  ;;  %446 = vmatprep.mubr.msk.f32.mxu0 %vm643_vm0, %v642_v0  ;;  %v87_v3 = vld [vmem:[#allocation3] sm:$0xff]  ;;  %vm97_vm1 = vcmask 130048   ;;  %v187_v4 = vld [vmem:[#allocation8 + $0x78] sm:$0xff]  ;;  %v186_v5 = vld [vmem:[#allocation8 + $0x70] sm:$0xff]  ;;  %vm381_vm2 = vcmask 57344  }
  0x35   :  { %449 = vmatprep.subr.mxu1 %v642_v0  ;;  %481 = vmatprep.mubr.msk.f32.mxu1 %vm643_vm0, %v642_v0  ;;  %v185_v6 = vld [vmem:[#allocation8 + $0x68] sm:$0xff]  ;;  %v184_v7 = vld [vmem:[#allocation8 + $0x60] sm:$0xff]  ;;  %v183_v8 = vld [vmem:[#allocation8 + $0x58] sm:$0xff]  ;;  %v375_v54 = vand.u32 127, %v374_v53  ;;  %v377_v55 = vshrl.u32 %v374_v53, 7 }
  0x36   :  { %443 = vmatpush3.msra.mxu0 %v89_v1  ;;  %450 = vmatpush3.msra.mxu1 %v187_v4  ;;  %v182_v9 = vld [vmem:[#allocation8 + $0x50] sm:$0xff]  ;;  %v181_v10 = vld [vmem:[#allocation8 + $0x48] sm:$0xff]  ;;  %v180_v11 = vld [vmem:[#allocation8 + $0x40] sm:$0xff] }
  0x37   :  { %444 = vmatprep.subr.mxu0 %v642_v0  ;;  %451 = vmatprep.subr.mxu1 %v642_v0  ;;  %v179_v12 = vld [vmem:[#allocation8 + $0x38] sm:$0xff]  ;;  %v178_v13 = vld [vmem:[#allocation8 + $0x30] sm:$0xff]  ;;  %v177_v14 = vld [vmem:[#allocation8 + $0x28] sm:$0xff]  ;;  %v378_v57 = vsub.s32 %v375_v54, %v377_v55 }
  0x38   :  { %445 = vmatpush3.msra.mxu0 %v88_v2  ;;  %452 = vmatpush3.msra.mxu1 %v186_v5  ;;  %v176_v15 = vld [vmem:[#allocation8 + $0x20] sm:$0xff]  ;;  %v175_v16 = vld [vmem:[#allocation8 + $0x18] sm:$0xff]  ;;  %v174_v17 = vld [vmem:[#allocation8 + $0x10] sm:$0xff] }
  0x39   :  { %447 = vmatmul.mubr.msk.f32.vlgmr.msra.gmra.mxu0 %vm97_vm1, %v87_v3  ;;  %453 = vmatprep.subr.mxu1 %v642_v0  ;;  %v173_v18 = vld [vmem:[#allocation8 + $0x8] sm:$0xff]  ;;  %v172_v19 = vld [vmem:[#allocation8] sm:$0xff]  ;;  %v281_v20 = vld [vmem:[#allocation9 + $0x78] sm:$0xff] }
  0x3a   :  { %484 = vmatprep.subr.mxu0 %v642_v0  ;;  %454 = vmatpush3.msra.mxu1 %v185_v6  ;;  %v280_v21 = vld [vmem:[#allocation9 + $0x70] sm:$0xff]  ;;  %v279_v22 = vld [vmem:[#allocation9 + $0x68] sm:$0xff]  ;;  %v278_v23 = vld [vmem:[#allocation9 + $0x60] sm:$0xff] }
  0x3b   :  { %516 = vmatprep.mubr.msk.f32.mxu0 %vm643_vm0, %v642_v0  ;;  %455 = vmatprep.subr.mxu1 %v642_v0  ;;  %v277_v24 = vld [vmem:[#allocation9 + $0x58] sm:$0xff]  ;;  %v276_v25 = vld [vmem:[#allocation9 + $0x50] sm:$0xff]  ;;  %v275_v26 = vld [vmem:[#allocation9 + $0x48] sm:$0xff] }
  0x3c   :  { %456 = vmatpush3.msra.mxu1 %v184_v7  ;;  %485 = vmatpush3.msra.mxu0 %v281_v20  ;;  %v274_v27 = vld [vmem:[#allocation9 + $0x40] sm:$0xff]  ;;  %v273_v28 = vld [vmem:[#allocation9 + $0x38] sm:$0xff]  ;;  %v272_v29 = vld [vmem:[#allocation9 + $0x30] sm:$0xff] }
  0x3d   :  { %457 = vmatprep.subr.mxu1 %v642_v0  ;;  %486 = vmatprep.subr.mxu0 %v642_v0  ;;  %v271_v30 = vld [vmem:[#allocation9 + $0x28] sm:$0xff]  ;;  %v270_v31 = vld [vmem:[#allocation9 + $0x20] sm:$0xff]  ;;  %v269_v32 = vld [vmem:[#allocation9 + $0x18] sm:$0xff] }
  0x3e   :  { %458 = vmatpush3.msra.mxu1 %v183_v8  ;;  %487 = vmatpush3.msra.mxu0 %v280_v21  ;;  %v400_v33 = vld [vmem:[%s776_s2] ss:$0 sm:$0xff]  ;;  %v268_v38 = vld [vmem:[#allocation9 + $0x10] sm:$0xff]  ;;  %v266_v40 = vld [vmem:[#allocation9] sm:$0xff] }
  0x3f   :  { %459 = vmatprep.subr.mxu1 %v642_v0  ;;  %488 = vmatprep.subr.mxu0 %v642_v0  ;;  %v267_v39 = vld [vmem:[#allocation9 + $0x8] sm:$0xff] }
  0x40   :  { %460 = vmatpush3.msra.mxu1 %v182_v9  ;;  %489 = vmatpush3.msra.mxu0 %v279_v22  ;;  %v402_v41 = vld [vmem:[%s778_s4] ss:$0 sm:$0xff] }
  0x41   :  { %461 = vmatprep.subr.mxu1 %v642_v0  ;;  %490 = vmatprep.subr.mxu0 %v642_v0  ;;  %v403_v46 = vld [vmem:[%s780_s6] ss:$0 sm:$0xff]  ;;  %s644_s6 = smov [#allocation11]  }
  0x42   :  { %462 = vmatpush3.msra.mxu1 %v181_v10  ;;  %491 = vmatpush3.msra.mxu0 %v278_v23  ;;  %v404_v50 = vld [vmem:[%s781_s7] ss:$0 sm:$0xff]  ;;  %s389_s14 = sshll.u32 %s644_s6, 4  ;;  %s390_s14 = int_to_ptr.vmem [resolvable:$true] %s389_s14 }
  0x43   :  { %463 = vmatprep.subr.mxu1 %v642_v0  ;;  %492 = vmatprep.subr.mxu0 %v642_v0  ;;  %s608_s7 = scalar_lea.vmem %s390_s14, 16  ;;  %s612_s15 = scalar_lea.vmem %s390_s14, 32 }
  0x44   :  { %464 = vmatpush3.msra.mxu1 %v180_v11  ;;  %493 = vmatpush3.msra.mxu0 %v277_v24  ;;  %p609_p6 = scmp.ne.s32.totalorder %s390_s14, %s608_s7  ;;  %p613_p7 = scmp.lt.s32.totalorder %s390_s14, %s390_s14 }
  0x45   :  { %465 = vmatprep.subr.mxu1 %v642_v0  ;;  %494 = vmatprep.subr.mxu0 %v642_v0  ;;  %p614_p8 = scmp.lt.s32.totalorder %s612_s15, %s608_s7 }
  0x46   :  { %466 = vmatpush3.msra.mxu1 %v179_v12  ;;  %495 = vmatpush3.msra.mxu0 %v276_v25 }
  0x47   :  { %467 = vmatprep.subr.mxu1 %v642_v0  ;;  %496 = vmatprep.subr.mxu0 %v642_v0  ;;  %p615_p9 = por %p614_p8, %p613_p7 }
  0x48   :  { %468 = vmatpush3.msra.mxu1 %v178_v13  ;;  %497 = vmatpush3.msra.mxu0 %v275_v26 }
  0x49   :  { %469 = vmatprep.subr.mxu1 %v642_v0  ;;  %498 = vmatprep.subr.mxu0 %v642_v0  ;;  %p616_p10 = pnand %p615_p9, %p609_p6 }
  0x4a   :  { %470 = vmatpush3.msra.mxu1 %v177_v14  ;;  %499 = vmatpush3.msra.mxu0 %v274_v27 }
  0x4b   :  { %471 = vmatprep.subr.mxu1 %v642_v0  ;;  %500 = vmatprep.subr.mxu0 %v642_v0 }
  0x4c   :  { %472 = vmatpush3.msra.mxu1 %v176_v15  ;;  %501 = vmatpush3.msra.mxu0 %v273_v28 }
  0x4d   :  { %473 = vmatprep.subr.mxu1 %v642_v0  ;;  %502 = vmatprep.subr.mxu0 %v642_v0 }
  0x4e   :  { %474 = vmatpush3.msra.mxu1 %v175_v16  ;;  %503 = vmatpush3.msra.mxu0 %v272_v29 }
  0x4f   :  { %475 = vmatprep.subr.mxu1 %v642_v0  ;;  %504 = vmatprep.subr.mxu0 %v642_v0 }
  0x50   :  { %476 = vmatpush3.msra.mxu1 %v174_v17  ;;  %505 = vmatpush3.msra.mxu0 %v271_v30 }
  0x51   :  { %477 = vmatprep.subr.mxu1 %v642_v0  ;;  %506 = vmatprep.subr.mxu0 %v642_v0 }
  0x52   :  { %478 = vmatpush3.msra.mxu1 %v173_v18  ;;  %507 = vmatpush3.msra.mxu0 %v270_v31 }
  0x53   :  { %479 = vmatprep.subr.mxu1 %v642_v0  ;;  %508 = vmatprep.subr.mxu0 %v642_v0 }
  0x54   :  { %480 = vmatpush3.msra.mxu1 %v172_v19  ;;  %509 = vmatpush3.msra.mxu0 %v269_v32 }
  0x55   :  { %510 = vmatprep.subr.mxu0 %v642_v0 }
  0x56   :  { %511 = vmatpush3.msra.mxu0 %v268_v38 }
  0x57   :  { %512 = vmatprep.subr.mxu0 %v642_v0 }
  0x58   :  { %513 = vmatpush3.msra.mxu0 %v267_v39 }
  0x59   :  { %514 = vmatprep.subr.mxu0 %v642_v0 }
  0x5a   :  { %515 = vmatpush3.msra.mxu0 %v266_v40 }
  0xf9   :  { %v167_v34 = vpop.f32.mrf.mxu0 }
  0xfa   :  { %v168_v35 = vadd.f32 %v400_v33, %v167_v34 }
  0xfb   :  { %v448_v36 = vpop.f32.mrf.mxu0 }
  0xfc   :  { %v171_v37 = vmax.f32 %v168_v35, 0.0 }
  0xfe   :  { %482 = vmatmul.mubr.f32.vlgmr.msra.gmra.mxu1 %v171_v37 }
 0x1be   :  { %v261_v42 = vpop.f32.mrf.mxu1 }
 0x1bf   :  { %v262_v43 = vadd.f32 %v402_v41, %v261_v42 }
 0x1c0   :  { %v483_v44 = vpop.f32.mrf.mxu1 }
 0x1c1   :  { %v265_v45 = vmax.f32 %v262_v43, 0.0 }
 0x1c3   :  { %517 = vmatmul.mubr.f32.vlgmr.msra.gmra.mxu0 %v265_v45 }
 0x283   :  { %v355_v47 = vpop.f32.mrf.mxu0 }
 0x284   :  { %v356_v48 = vadd.f32 %v403_v46, %v355_v47 }
 0x285   :  { %v518_v49 = vpop.f32.mrf.mxu0 }
 0x286   :  { %v359_v51 = vmax.f32 %v356_v48, 0.0 }
 0x288   :  { %v367_v52 = vmul.f32 %v404_v50, %v359_v51 }
 0x28a   :  { %368 = vadd.xlane.f32.xlu0 %v367_v52 }
 0x313   :  { %v369_v58 = vpop.xlane.xlu0 %368 }
 0x314   :  { %v372_v59 = vadd.f32 %v371_v56, %v369_v58 }
 0x316   :  { %v379_v60 = vrot.slane %v372_v59, %v378_v57 }
 0x318   :  { %382 = vst.msk [vmem:[#allocation11] sm:$0x1] %vm381_vm2, %v379_v60 }
 0x319   :  { %619 = shalt.err (!%p616_p10)
}
 0x31a   :  { %392 = dma.vmem_to_hbm [thread:$0]  %s390_s14, 16, %s783_s9, [#allocation5]  }
 0x31b   :  { %634 = dma.done.wait [#allocation5], 16  }
 0x31c   :  { %635 = vsyncadd [#allocation5], 4294967280 }
 0x31d   :  { %396 = vsyncpa [#allocation4], 1 }
 0x31e   :  { %397 = vsyncpa [#allocation7], 1 }
 0x31f   :  { %398 = vsyncpa [#allocation10], 1 }
 0x320   :  { %399 = vsyncpa [#allocation5], 1 }

// kernel: _critic_forward_jit.1
= control target key start
LH: loop header
LB: loop body
LE: loop exit
PB: predicated region body
PF: predicated region fallthrough
CT: control target
= control target key end

     0   :  { %15 = vsyncpa [#allocation4], 0  ;;  %s774_s0 = inlined_call_operand.hbm [shape: f32[8,16], index: 0, kind: input, shape index: {}]   ;;  %s775_s1 = inlined_call_operand.hbm [shape: f32[16,128], index: 1, kind: input, shape index: {}]   ;;  %s776_s2 = inlined_call_operand.vmem [shape: f32[1,128], index: 2, kind: input, shape index: {}]   ;;  %s777_s3 = inlined_call_operand.hbm [shape: f32[128,128], index: 3, kind: input, shape index: {}]   ;;  %s778_s4 = inlined_call_operand.vmem [shape: f32[1,128], index: 4, kind: input, shape index: {}]   ;;  %s779_s5 = inlined_call_operand.hbm [shape: f32[128,128], index: 5, kind: input, shape index: {}]   ;;  %s780_s6 = inlined_call_operand.vmem [shape: f32[1,128], index: 6, kind: input, shape index: {}]   ;;  %s781_s7 = inlined_call_operand.vmem [shape: f32[1,128], index: 7, kind: input, shape index: {}]   ;;  %s782_s8 = inlined_call_operand.<no memory space> [shape: f32[1], index: 8, kind: input, shape index: {}]   ;;  %s783_s9 = inlined_call_operand.hbm [shape: f32[1,1,8], index: 9, kind: output, shape index: {}]  }
   0x1   :  { %16 = vsyncpa [#allocation7], 0 }
   0x2   :  { %17 = vsyncpa [#allocation10], 0 }
   0x3   :  { %18 = vsyncpa [#allocation5], 0  ;;  %s636_s30 = smov [#allocation6]  }
   0x4   :  { %s34_s10 = sshll.u32 %s636_s30, 4  ;;  %s35_s10 = int_to_ptr.vmem [resolvable:$true] %s34_s10 }
   0x5   :  { %s536_s11 = scalar_lea.vmem %s35_s10, 256  ;;  %p541_p1 = scmp.lt.s32.totalorder %s35_s10, %s35_s10 }
   0x6   :  { %p537_p0 = scmp.ne.s32.totalorder %s35_s10, %s536_s11  ;;  %p542_p2 = scmp.lt.s32.totalorder %s536_s11, %s536_s11 }
   0x8   :  { %p543_p3 = por %p542_p2, %p541_p1 }
   0xa   :  { %p544_p4 = pnand %p543_p3, %p537_p0 }
   0xc   :  { %547 = shalt.err (!%p544_p4)
}
   0xd   :  { %s637_s12 = smov 128   ;;  %s638_s13 = smov 8  }
   0xe   :  { %40 = dma.hbm_to_vmem [thread:$0]  %s775_s1, 256, %s35_s10, [#allocation7], %s637_s12, %s637_s12, %s638_s13  }
   0xf   :  { %s639_s16 = smov [#allocation3]   ;;  %s640_s18 = smov [#allocation8]  }
  0x10   :  { %s25_s17 = sshll.u32 %s639_s16, 4  ;;  %s48_s19 = sshll.u32 %s640_s18, 4  ;;  %s26_s17 = int_to_ptr.vmem [resolvable:$true] %s25_s17  ;;  %s49_s19 = int_to_ptr.vmem [resolvable:$true] %s48_s19 }
  0x11   :  { %s556_s20 = scalar_lea.vmem %s26_s17, 128  ;;  %p561_p6 = scmp.lt.s32.totalorder %s26_s17, %s26_s17 }
  0x12   :  { %p557_p5 = scmp.ne.s32.totalorder %s26_s17, %s556_s20  ;;  %p562_p7 = scmp.lt.s32.totalorder %s556_s20, %s556_s20 }
  0x14   :  { %p563_p8 = por %p562_p7, %p561_p6 }
  0x16   :  { %p564_p9 = pnand %p563_p8, %p557_p5 }
  0x18   :  { %567 = shalt.err (!%p564_p9)
}
  0x19   :  { %28 = dma.hbm_to_vmem [thread:$0]  %s774_s0, 128, %s26_s17, [#allocation4]  }
  0x1a   :  { %s576_s23 = scalar_lea.vmem %s49_s19, 2048  ;;  %p581_p11 = scmp.lt.s32.totalorder %s49_s19, %s49_s19 }
  0x1b   :  { %p577_p10 = scmp.ne.s32.totalorder %s49_s19, %s576_s23  ;;  %p582_p12 = scmp.lt.s32.totalorder %s576_s23, %s576_s23 }
  0x1d   :  { %p583_p13 = por %p582_p12, %p581_p11 }
  0x1f   :  { %p584_p0 = pnand %p583_p13, %p577_p10 }
  0x21   :  { %587 = shalt.err (!%p584_p0)
}
  0x22   :  { %54 = dma.hbm_to_vmem [thread:$0]  %s777_s3, 2048, %s49_s19, [#allocation7], %s637_s12, %s637_s12, %s638_s13  }
  0x23   :  { %s641_s25 = smov [#allocation9]  }
  0x24   :  { %s62_s26 = sshll.u32 %s641_s25, 4  ;;  %s63_s26 = int_to_ptr.vmem [resolvable:$true] %s62_s26 }
  0x25   :  { %s596_s27 = scalar_lea.vmem %s63_s26, 2048  ;;  %p601_p2 = scmp.lt.s32.totalorder %s63_s26, %s63_s26 }
  0x26   :  { %p597_p1 = scmp.ne.s32.totalorder %s63_s26, %s596_s27  ;;  %p602_p3 = scmp.lt.s32.totalorder %s596_s27, %s596_s27 }
  0x28   :  { %p603_p4 = por %p602_p3, %p601_p2 }
  0x2a   :  { %p604_p5 = pnand %p603_p4, %p597_p1 }
  0x2c   :  { %607 = shalt.err (!%p604_p5)
}
  0x2d   :  { %68 = dma.hbm_to_vmem [thread:$0]  %s779_s5, 2048, %s63_s26, [#allocation10], %s637_s12, %s637_s12, %s638_s13  }
  0x2e   :  { %628 = dma.done.wait [#allocation4], 128  }
  0x2f   :  { %629 = vsyncadd [#allocation4], 4294967168 }
  0x30   :  { %630 = dma.done.wait [#allocation7], 2304  }
  0x31   :  { %631 = vsyncadd [#allocation7], 4294964992 }
  0x32   :  { %632 = dma.done.wait [#allocation10], 2048  }
  0x33   :  { %633 = vsyncadd [#allocation10], 4294965248  ;;  %v642_v0 = vmov 0.0   ;;  %vm643_vm0 = vmmov 0   ;;  %v89_v1 = vld [vmem:[#allocation6 + $0x8] sm:$0xff]  ;;  %v88_v2 = vld [vmem:[#allocation6] sm:$0xff]  ;;  %v374_v53 = vlaneseq  ;;  %v371_v56 = vstv %s782_s8 }
  0x34   :  { %442 = vmatprep.subr.mxu0 %v642_v0  ;;  %446 = vmatprep.mubr.msk.f32.mxu0 %vm643_vm0, %v642_v0  ;;  %v87_v3 = vld [vmem:[#allocation3] sm:$0xff]  ;;  %vm97_vm1 = vcmask 130048   ;;  %v187_v4 = vld [vmem:[#allocation8 + $0x78] sm:$0xff]  ;;  %v186_v5 = vld [vmem:[#allocation8 + $0x70] sm:$0xff]  ;;  %vm381_vm2 = vcmask 57344  }
  0x35   :  { %449 = vmatprep.subr.mxu1 %v642_v0  ;;  %481 = vmatprep.mubr.msk.f32.mxu1 %vm643_vm0, %v642_v0  ;;  %v185_v6 = vld [vmem:[#allocation8 + $0x68] sm:$0xff]  ;;  %v184_v7 = vld [vmem:[#allocation8 + $0x60] sm:$0xff]  ;;  %v183_v8 = vld [vmem:[#allocation8 + $0x58] sm:$0xff]  ;;  %v375_v54 = vand.u32 127, %v374_v53  ;;  %v377_v55 = vshrl.u32 %v374_v53, 7 }
  0x36   :  { %443 = vmatpush3.msra.mxu0 %v89_v1  ;;  %450 = vmatpush3.msra.mxu1 %v187_v4  ;;  %v182_v9 = vld [vmem:[#allocation8 + $0x50] sm:$0xff]  ;;  %v181_v10 = vld [vmem:[#allocation8 + $0x48] sm:$0xff]  ;;  %v180_v11 = vld [vmem:[#allocation8 + $0x40] sm:$0xff] }
  0x37   :  { %444 = vmatprep.subr.mxu0 %v642_v0  ;;  %451 = vmatprep.subr.mxu1 %v642_v0  ;;  %v179_v12 = vld [vmem:[#allocation8 + $0x38] sm:$0xff]  ;;  %v178_v13 = vld [vmem:[#allocation8 + $0x30] sm:$0xff]  ;;  %v177_v14 = vld [vmem:[#allocation8 + $0x28] sm:$0xff]  ;;  %v378_v57 = vsub.s32 %v375_v54, %v377_v55 }
  0x38   :  { %445 = vmatpush3.msra.mxu0 %v88_v2  ;;  %452 = vmatpush3.msra.mxu1 %v186_v5  ;;  %v176_v15 = vld [vmem:[#allocation8 + $0x20] sm:$0xff]  ;;  %v175_v16 = vld [vmem:[#allocation8 + $0x18] sm:$0xff]  ;;  %v174_v17 = vld [vmem:[#allocation8 + $0x10] sm:$0xff] }
  0x39   :  { %447 = vmatmul.mubr.msk.f32.vlgmr.msra.gmra.mxu0 %vm97_vm1, %v87_v3  ;;  %453 = vmatprep.subr.mxu1 %v642_v0  ;;  %v173_v18 = vld [vmem:[#allocation8 + $0x8] sm:$0xff]  ;;  %v172_v19 = vld [vmem:[#allocation8] sm:$0xff]  ;;  %v281_v20 = vld [vmem:[#allocation9 + $0x78] sm:$0xff] }
  0x3a   :  { %484 = vmatprep.subr.mxu0 %v642_v0  ;;  %454 = vmatpush3.msra.mxu1 %v185_v6  ;;  %v280_v21 = vld [vmem:[#allocation9 + $0x70] sm:$0xff]  ;;  %v279_v22 = vld [vmem:[#allocation9 + $0x68] sm:$0xff]  ;;  %v278_v23 = vld [vmem:[#allocation9 + $0x60] sm:$0xff] }
  0x3b   :  { %516 = vmatprep.mubr.msk.f32.mxu0 %vm643_vm0, %v642_v0  ;;  %455 = vmatprep.subr.mxu1 %v642_v0  ;;  %v277_v24 = vld [vmem:[#allocation9 + $0x58] sm:$0xff]  ;;  %v276_v25 = vld [vmem:[#allocation9 + $0x50] sm:$0xff]  ;;  %v275_v26 = vld [vmem:[#allocation9 + $0x48] sm:$0xff] }
  0x3c   :  { %456 = vmatpush3.msra.mxu1 %v184_v7  ;;  %485 = vmatpush3.msra.mxu0 %v281_v20  ;;  %v274_v27 = vld [vmem:[#allocation9 + $0x40] sm:$0xff]  ;;  %v273_v28 = vld [vmem:[#allocation9 + $0x38] sm:$0xff]  ;;  %v272_v29 = vld [vmem:[#allocation9 + $0x30] sm:$0xff] }
  0x3d   :  { %457 = vmatprep.subr.mxu1 %v642_v0  ;;  %486 = vmatprep.subr.mxu0 %v642_v0  ;;  %v271_v30 = vld [vmem:[#allocation9 + $0x28] sm:$0xff]  ;;  %v270_v31 = vld [vmem:[#allocation9 + $0x20] sm:$0xff]  ;;  %v269_v32 = vld [vmem:[#allocation9 + $0x18] sm:$0xff] }
  0x3e   :  { %458 = vmatpush3.msra.mxu1 %v183_v8  ;;  %487 = vmatpush3.msra.mxu0 %v280_v21  ;;  %v400_v33 = vld [vmem:[%s776_s2] ss:$0 sm:$0xff]  ;;  %v268_v38 = vld [vmem:[#allocation9 + $0x10] sm:$0xff]  ;;  %v266_v40 = vld [vmem:[#allocation9] sm:$0xff] }
  0x3f   :  { %459 = vmatprep.subr.mxu1 %v642_v0  ;;  %488 = vmatprep.subr.mxu0 %v642_v0  ;;  %v267_v39 = vld [vmem:[#allocation9 + $0x8] sm:$0xff] }
  0x40   :  { %460 = vmatpush3.msra.mxu1 %v182_v9  ;;  %489 = vmatpush3.msra.mxu0 %v279_v22  ;;  %v402_v41 = vld [vmem:[%s778_s4] ss:$0 sm:$0xff] }
  0x41   :  { %461 = vmatprep.subr.mxu1 %v642_v0  ;;  %490 = vmatprep.subr.mxu0 %v642_v0  ;;  %v403_v46 = vld [vmem:[%s780_s6] ss:$0 sm:$0xff]  ;;  %s644_s6 = smov [#allocation11]  }
  0x42   :  { %462 = vmatpush3.msra.mxu1 %v181_v10  ;;  %491 = vmatpush3.msra.mxu0 %v278_v23  ;;  %v404_v50 = vld [vmem:[%s781_s7] ss:$0 sm:$0xff]  ;;  %s389_s14 = sshll.u32 %s644_s6, 4  ;;  %s390_s14 = int_to_ptr.vmem [resolvable:$true] %s389_s14 }
  0x43   :  { %463 = vmatprep.subr.mxu1 %v642_v0  ;;  %492 = vmatprep.subr.mxu0 %v642_v0  ;;  %s608_s7 = scalar_lea.vmem %s390_s14, 16  ;;  %s612_s15 = scalar_lea.vmem %s390_s14, 32 }
  0x44   :  { %464 = vmatpush3.msra.mxu1 %v180_v11  ;;  %493 = vmatpush3.msra.mxu0 %v277_v24  ;;  %p609_p6 = scmp.ne.s32.totalorder %s390_s14, %s608_s7  ;;  %p613_p7 = scmp.lt.s32.totalorder %s390_s14, %s390_s14 }
  0x45   :  { %465 = vmatprep.subr.mxu1 %v642_v0  ;;  %494 = vmatprep.subr.mxu0 %v642_v0  ;;  %p614_p8 = scmp.lt.s32.totalorder %s612_s15, %s608_s7 }
  0x46   :  { %466 = vmatpush3.msra.mxu1 %v179_v12  ;;  %495 = vmatpush3.msra.mxu0 %v276_v25 }
  0x47   :  { %467 = vmatprep.subr.mxu1 %v642_v0  ;;  %496 = vmatprep.subr.mxu0 %v642_v0  ;;  %p615_p9 = por %p614_p8, %p613_p7 }
  0x48   :  { %468 = vmatpush3.msra.mxu1 %v178_v13  ;;  %497 = vmatpush3.msra.mxu0 %v275_v26 }
  0x49   :  { %469 = vmatprep.subr.mxu1 %v642_v0  ;;  %498 = vmatprep.subr.mxu0 %v642_v0  ;;  %p616_p10 = pnand %p615_p9, %p609_p6 }
  0x4a   :  { %470 = vmatpush3.msra.mxu1 %v177_v14  ;;  %499 = vmatpush3.msra.mxu0 %v274_v27 }
  0x4b   :  { %471 = vmatprep.subr.mxu1 %v642_v0  ;;  %500 = vmatprep.subr.mxu0 %v642_v0 }
  0x4c   :  { %472 = vmatpush3.msra.mxu1 %v176_v15  ;;  %501 = vmatpush3.msra.mxu0 %v273_v28 }
  0x4d   :  { %473 = vmatprep.subr.mxu1 %v642_v0  ;;  %502 = vmatprep.subr.mxu0 %v642_v0 }
  0x4e   :  { %474 = vmatpush3.msra.mxu1 %v175_v16  ;;  %503 = vmatpush3.msra.mxu0 %v272_v29 }
  0x4f   :  { %475 = vmatprep.subr.mxu1 %v642_v0  ;;  %504 = vmatprep.subr.mxu0 %v642_v0 }
  0x50   :  { %476 = vmatpush3.msra.mxu1 %v174_v17  ;;  %505 = vmatpush3.msra.mxu0 %v271_v30 }
  0x51   :  { %477 = vmatprep.subr.mxu1 %v642_v0  ;;  %506 = vmatprep.subr.mxu0 %v642_v0 }
  0x52   :  { %478 = vmatpush3.msra.mxu1 %v173_v18  ;;  %507 = vmatpush3.msra.mxu0 %v270_v31 }
  0x53   :  { %479 = vmatprep.subr.mxu1 %v642_v0  ;;  %508 = vmatprep.subr.mxu0 %v642_v0 }
  0x54   :  { %480 = vmatpush3.msra.mxu1 %v172_v19  ;;  %509 = vmatpush3.msra.mxu0 %v269_v32 }
  0x55   :  { %510 = vmatprep.subr.mxu0 %v642_v0 }
  0x56   :  { %511 = vmatpush3.msra.mxu0 %v268_v38 }
  0x57   :  { %512 = vmatprep.subr.mxu0 %v642_v0 }
  0x58   :  { %513 = vmatpush3.msra.mxu0 %v267_v39 }
  0x59   :  { %514 = vmatprep.subr.mxu0 %v642_v0 }
  0x5a   :  { %515 = vmatpush3.msra.mxu0 %v266_v40 }
  0xf9   :  { %v167_v34 = vpop.f32.mrf.mxu0 }
  0xfa   :  { %v168_v35 = vadd.f32 %v400_v33, %v167_v34 }
  0xfb   :  { %v448_v36 = vpop.f32.mrf.mxu0 }
  0xfc   :  { %v171_v37 = vmax.f32 %v168_v35, 0.0 }
  0xfe   :  { %482 = vmatmul.mubr.f32.vlgmr.msra.gmra.mxu1 %v171_v37 }
 0x1be   :  { %v261_v42 = vpop.f32.mrf.mxu1 }
 0x1bf   :  { %v262_v43 = vadd.f32 %v402_v41, %v261_v42 }
 0x1c0   :  { %v483_v44 = vpop.f32.mrf.mxu1 }
 0x1c1   :  { %v265_v45 = vmax.f32 %v262_v43, 0.0 }
 0x1c3   :  { %517 = vmatmul.mubr.f32.vlgmr.msra.gmra.mxu0 %v265_v45 }
 0x283   :  { %v355_v47 = vpop.f32.mrf.mxu0 }
 0x284   :  { %v356_v48 = vadd.f32 %v403_v46, %v355_v47 }
 0x285   :  { %v518_v49 = vpop.f32.mrf.mxu0 }
 0x286   :  { %v359_v51 = vmax.f32 %v356_v48, 0.0 }
 0x288   :  { %v367_v52 = vmul.f32 %v404_v50, %v359_v51 }
 0x28a   :  { %368 = vadd.xlane.f32.xlu0 %v367_v52 }
 0x313   :  { %v369_v58 = vpop.xlane.xlu0 %368 }
 0x314   :  { %v372_v59 = vadd.f32 %v371_v56, %v369_v58 }
 0x316   :  { %v379_v60 = vrot.slane %v372_v59, %v378_v57 }
 0x318   :  { %382 = vst.msk [vmem:[#allocation11] sm:$0x1] %vm381_vm2, %v379_v60 }
 0x319   :  { %619 = shalt.err (!%p616_p10)
}
 0x31a   :  { %392 = dma.vmem_to_hbm [thread:$0]  %s390_s14, 16, %s783_s9, [#allocation5]  }
 0x31b   :  { %634 = dma.done.wait [#allocation5], 16  }
 0x31c   :  { %635 = vsyncadd [#allocation5], 4294967280 }
 0x31d   :  { %396 = vsyncpa [#allocation4], 1 }
 0x31e   :  { %397 = vsyncpa [#allocation7], 1 }
 0x31f   :  { %398 = vsyncpa [#allocation10], 1 }
 0x320   :  { %399 = vsyncpa [#allocation5], 1 }

</bundles_post_ra>
